<compile_context>
chip_gen: v7x
topology: tpu7x:2x2x1
jax: 0.10.0
libtpu: 0.0.40
codegen_flags: <defaults>
</compile_context>

<pallas_src>
import math
import functools

import jax
import jax.numpy as jnp
from jax.experimental import pallas as pl
from jax.experimental.pallas import tpu as pltpu


LANE = 128
SUBLANE = 8
_NEG_BIG = -1.0e30  # bias for padded class columns -> exp() underflows to exactly 0


def _round_up(v, m):
    return ((v + m - 1) // m) * m


def _gcn_kernel(x_ref, adj_ref, w1_ref, b1_ref, w2_ref, b2_ref,
                wl_ref, bl_ref, out_ref):
    bf16 = jnp.bfloat16
    f32 = jnp.float32

    x = x_ref[...]        # [Np, F]   bf16
    adj = adj_ref[...]    # [Np, Np]  bf16

    # ---- gc1: relu(adj @ (x @ W1) + b1) ----
    s1 = jnp.dot(x, w1_ref[...], preferred_element_type=f32)              # [Np, Hp] f32
    h1 = jnp.dot(adj, s1.astype(bf16), preferred_element_type=f32) + b1_ref[...]
    h1 = jnp.maximum(h1, 0.0)
    # dropout (eval) -> identity

    # ---- gc2: relu(adj @ (h1 @ W2) + b2) ----
    s2 = jnp.dot(h1.astype(bf16), w2_ref[...], preferred_element_type=f32)
    h2 = jnp.dot(adj, s2.astype(bf16), preferred_element_type=f32) + b2_ref[...]
    h2 = jnp.maximum(h2, 0.0)
    # dropout (eval) -> identity

    # ---- linear: h2 @ Wl + bl  (padded class cols carry bias = -1e30) ----
    pred = jnp.dot(h2.astype(bf16), wl_ref[...], preferred_element_type=f32) + bl_ref[...]

    # ---- log_softmax over class axis (lane axis, 128 wide, f32) ----
    m = jnp.max(pred, axis=1, keepdims=True)
    z = pred - m                                   # padded cols ~ -1e30 -> exp == 0
    lse = jnp.log(jnp.sum(jnp.exp(z), axis=1, keepdims=True))
    out_ref[...] = (z - lse).astype(out_ref.dtype)


@jax.jit
def gcn_forward(x, adj, w1, b1, w2, b2, wl, bl):
    n, nfeat = x.shape
    nhid = w1.shape[1]
    nclass = wl.shape[1]

    n_pad = _round_up(n, SUBLANE)
    h_pad = _round_up(nhid, LANE)
    c_pad = _round_up(nclass, LANE)

    bf16 = jnp.bfloat16
    f32 = jnp.float32

    # ---- lane/sublane padding + bf16 casts (zero pads are exact in f32 accumulation) ----
    x_p = jnp.pad(x, ((0, n_pad - n), (0, 0))).astype(bf16)                       # [Np, F]
    adj_p = jnp.pad(adj, ((0, n_pad - n), (0, n_pad - n))).astype(bf16)           # [Np, Np]
    w1_p = jnp.pad(w1, ((0, 0), (0, h_pad - nhid))).astype(bf16)                  # [F, Hp]
    b1_p = jnp.pad(b1, ((0, 0), (0, h_pad - nhid))).astype(f32)                   # [1, Hp]
    w2_p = jnp.pad(w2, ((0, h_pad - nhid), (0, h_pad - nhid))).astype(bf16)       # [Hp, Hp]
    b2_p = jnp.pad(b2, ((0, 0), (0, h_pad - nhid))).astype(f32)                   # [1, Hp]
    wl_p = jnp.pad(wl, ((0, h_pad - nhid), (0, c_pad - nclass))).astype(bf16)     # [Hp, Cp]
    # padded class columns get a huge negative bias so they vanish in the logsumexp
    bl_p = jnp.pad(bl.astype(f32), ((0, 0), (0, c_pad - nclass)),
                   constant_values=_NEG_BIG)                                      # [1, Cp]

    # ---- cost estimate (advisory) ----
    flops = 2 * (n_pad * nfeat * h_pad        # x @ W1
                 + n_pad * n_pad * h_pad      # adj @ s1
                 + n_pad * h_pad * h_pad      # h1 @ W2
                 + n_pad * n_pad * h_pad      # adj @ s2
                 + n_pad * h_pad * c_pad)     # h2 @ Wl
    transcendentals = n_pad * c_pad + n_pad   # exp + log
    operands = (x_p, adj_p, w1_p, b1_p, w2_p, b2_p, wl_p, bl_p)
    in_bytes = sum(a.size * a.dtype.itemsize for a in operands)
    out_bytes = n_pad * c_pad * 4
    cost = pl.CostEstimate(flops=flops, transcendentals=transcendentals,
                           bytes_accessed=in_bytes + out_bytes)

    # ---- VMEM budget: operands + lane-dense f32 intermediates, with headroom ----
    interm_bytes = 5 * n_pad * max(h_pad, c_pad) * 4
    vmem_needed = 2 * (in_bytes + out_bytes) + interm_bytes + (2 << 20)
    vmem_limit = int(min(max(vmem_needed, 16 << 20), 32 << 20))

    vmem = pl.BlockSpec(memory_space=pltpu.MemorySpace.VMEM)
    out_pad = pl.pallas_call(
        _gcn_kernel,
        out_shape=jax.ShapeDtypeStruct((n_pad, c_pad), f32),
        in_specs=[vmem] * 8,
        out_specs=vmem,
        compiler_params=pltpu.CompilerParams(vmem_limit_bytes=vmem_limit),
        cost_estimate=cost,
    )(*operands)

    return out_pad[:n, :nclass]


# ---------------------------------------------------------------------------
# References
# ---------------------------------------------------------------------------
def _reference_f32(x, adj, w1, b1, w2, b2, wl, bl):
    """Faithful f32 semantics of the PyTorch module (eval mode)."""
    h1 = jax.nn.relu(adj @ (x @ w1) + b1)
    h2 = jax.nn.relu(adj @ (h1 @ w2) + b2)
    pred = h2 @ wl + bl
    return jax.nn.log_softmax(pred, axis=1)


def _reference_bf16(x, adj, w1, b1, w2, b2, wl, bl):
    """Same math with bf16 matmul operands / f32 accumulation, matching the kernel."""
    bf16, f32 = jnp.bfloat16, jnp.float32

    def mm(a, b):
        return jnp.dot(a.astype(bf16), b.astype(bf16), preferred_element_type=f32)

    h1 = jax.nn.relu(mm(adj, mm(x, w1)) + b1)
    h2 = jax.nn.relu(mm(adj, mm(h1, w2)) + b2)
    pred = mm(h2, wl) + bl
    return jax.nn.log_softmax(pred, axis=1)


def _init_params(key, nfeat, nhid, nclass):
    ks = jax.random.split(key, 6)
    # GraphConvolution.reset_parameters: uniform(-stdv, stdv), stdv = 1/sqrt(out_features)
    stdv1 = 1.0 / math.sqrt(nhid)
    w1 = jax.random.uniform(ks[0], (nfeat, nhid), jnp.float32, -stdv1, stdv1)
    b1 = jax.random.uniform(ks[1], (1, nhid), jnp.float32, -stdv1, stdv1)
    stdv2 = 1.0 / math.sqrt(nhid)
    w2 = jax.random.uniform(ks[2], (nhid, nhid), jnp.float32, -stdv2, stdv2)
    b2 = jax.random.uniform(ks[3], (1, nhid), jnp.float32, -stdv2, stdv2)
    # nn.Linear(nhid, nclass)
    bound = 1.0 / math.sqrt(nhid)
    wl = jax.random.uniform(ks[4], (nhid, nclass), jnp.float32, -bound, bound)  # [in, out] (transposed vs torch)
    bl = jax.random.uniform(ks[5], (1, nclass), jnp.float32, -bound, bound)
    return w1, b1, w2, b2, wl, bl


if __name__ == "__main__":
    N, NFEAT, NHID, NCLASS = 128, 64, 32, 8

    key = jax.random.PRNGKey(0)
    kx, kadj, kparams = jax.random.split(key, 3)

    x = jax.random.normal(kx, (N, NFEAT), jnp.float32)

    # Symmetric row-normalized "adjacency" (dense stand-in for the sparse adj).
    a = (jax.random.uniform(kadj, (N, N)) < 0.05).astype(jnp.float32)
    a = a + a.T + jnp.eye(N, dtype=jnp.float32)
    a = jnp.minimum(a, 1.0)
    adj = a / jnp.sum(a, axis=1, keepdims=True)

    w1, b1, w2, b2, wl, bl = _init_params(kparams, NFEAT, NHID, NCLASS)

    out = gcn_forward(x, adj, w1, b1, w2, b2, wl, bl)
    out = jax.block_until_ready(out)
    assert out.shape == (N, NCLASS)

    # Exact-precision check: kernel vs a JAX reference with identical bf16/f32 mix.
    ref_bf16 = _reference_bf16(x, adj, w1, b1, w2, b2, wl, bl)
    assert jnp.allclose(out, ref_bf16, atol=1e-3, rtol=1e-3), "mismatch vs bf16-matched reference"

    # Semantic check: kernel vs pure-f32 PyTorch-equivalent reference (bf16 tolerance).
    ref_f32 = _reference_f32(x, adj, w1, b1, w2, b2, wl, bl)
    assert jnp.allclose(out, ref_f32, atol=3e-2, rtol=3e-2), "mismatch vs f32 reference"

    print("KERNEL_OK")
</pallas_src>

<mosaic_0001>
module attributes {stable_mosaic.version = 11 : i64} {
  func.func @_gcn_kernel(%arg0: memref<128x64xbf16, #tpu.memory_space<vmem>>, %arg1: memref<128x128xbf16, #tpu.memory_space<vmem>>, %arg2: memref<64x128xbf16, #tpu.memory_space<vmem>>, %arg3: memref<1x128xf32, #tpu.memory_space<vmem>>, %arg4: memref<128x128xbf16, #tpu.memory_space<vmem>>, %arg5: memref<1x128xf32, #tpu.memory_space<vmem>>, %arg6: memref<128x128xbf16, #tpu.memory_space<vmem>>, %arg7: memref<1x128xf32, #tpu.memory_space<vmem>>, %arg8: memref<128x128xf32, #tpu.memory_space<vmem>>) attributes {dimension_semantics = [], scalar_prefetch = 0 : i64, scratch_operands = 0 : i64, tpu.core_type = #tpu.core_type<tc>} {
    %c0 = arith.constant 0 : index
    %c0_0 = arith.constant 0 : index
    %0 = vector.load %arg0[%c0, %c0_0] : memref<128x64xbf16, #tpu.memory_space<vmem>>, vector<128x64xbf16>
    %c0_1 = arith.constant 0 : index
    %c0_2 = arith.constant 0 : index
    %1 = vector.load %arg1[%c0_1, %c0_2] : memref<128x128xbf16, #tpu.memory_space<vmem>>, vector<128x128xbf16>
    %c0_3 = arith.constant 0 : index
    %c0_4 = arith.constant 0 : index
    %2 = vector.load %arg2[%c0_3, %c0_4] : memref<64x128xbf16, #tpu.memory_space<vmem>>, vector<64x128xbf16>
    %cst = arith.constant dense<0.000000e+00> : vector<128x128xf32>
    %3 = tpu.matmul %0, %2, %cst {dimension_numbers = #tpu.dot_dimension_numbers<[1], [0], [0], [1], [0, 0, 1, 1], [], []>} : vector<128x64xbf16>, vector<64x128xbf16>, vector<128x128xf32> -> vector<128x128xf32>
    %4 = arith.truncf %3 : vector<128x128xf32> to vector<128x128xbf16>
    %cst_5 = arith.constant dense<0.000000e+00> : vector<128x128xf32>
    %5 = tpu.matmul %1, %4, %cst_5 {dimension_numbers = #tpu.dot_dimension_numbers<[1], [0], [0], [1], [0, 0, 1, 1], [], []>} : vector<128x128xbf16>, vector<128x128xbf16>, vector<128x128xf32> -> vector<128x128xf32>
    %c0_6 = arith.constant 0 : index
    %c0_7 = arith.constant 0 : index
    %6 = vector.load %arg3[%c0_6, %c0_7] : memref<1x128xf32, #tpu.memory_space<vmem>>, vector<1x128xf32>
    %7 = vector.broadcast %6 : vector<1x128xf32> to vector<128x128xf32>
    %8 = arith.addf %5, %7 : vector<128x128xf32>
    %cst_8 = arith.constant 0.000000e+00 : f32
    %9 = vector.broadcast %cst_8 : f32 to vector<128x128xf32>
    %10 = arith.maximumf %8, %9 : vector<128x128xf32>
    %11 = arith.truncf %10 : vector<128x128xf32> to vector<128x128xbf16>
    %c0_9 = arith.constant 0 : index
    %c0_10 = arith.constant 0 : index
    %12 = vector.load %arg4[%c0_9, %c0_10] : memref<128x128xbf16, #tpu.memory_space<vmem>>, vector<128x128xbf16>
    %cst_11 = arith.constant dense<0.000000e+00> : vector<128x128xf32>
    %13 = tpu.matmul %11, %12, %cst_11 {dimension_numbers = #tpu.dot_dimension_numbers<[1], [0], [0], [1], [0, 0, 1, 1], [], []>} : vector<128x128xbf16>, vector<128x128xbf16>, vector<128x128xf32> -> vector<128x128xf32>
    %14 = arith.truncf %13 : vector<128x128xf32> to vector<128x128xbf16>
    %cst_12 = arith.constant dense<0.000000e+00> : vector<128x128xf32>
    %15 = tpu.matmul %1, %14, %cst_12 {dimension_numbers = #tpu.dot_dimension_numbers<[1], [0], [0], [1], [0, 0, 1, 1], [], []>} : vector<128x128xbf16>, vector<128x128xbf16>, vector<128x128xf32> -> vector<128x128xf32>
    %c0_13 = arith.constant 0 : index
    %c0_14 = arith.constant 0 : index
    %16 = vector.load %arg5[%c0_13, %c0_14] : memref<1x128xf32, #tpu.memory_space<vmem>>, vector<1x128xf32>
    %17 = vector.broadcast %16 : vector<1x128xf32> to vector<128x128xf32>
    %18 = arith.addf %15, %17 : vector<128x128xf32>
    %cst_15 = arith.constant 0.000000e+00 : f32
    %19 = vector.broadcast %cst_15 : f32 to vector<128x128xf32>
    %20 = arith.maximumf %18, %19 : vector<128x128xf32>
    %21 = arith.truncf %20 : vector<128x128xf32> to vector<128x128xbf16>
    %c0_16 = arith.constant 0 : index
    %c0_17 = arith.constant 0 : index
    %22 = vector.load %arg6[%c0_16, %c0_17] : memref<128x128xbf16, #tpu.memory_space<vmem>>, vector<128x128xbf16>
    %cst_18 = arith.constant dense<0.000000e+00> : vector<128x128xf32>
    %23 = tpu.matmul %21, %22, %cst_18 {dimension_numbers = #tpu.dot_dimension_numbers<[1], [0], [0], [1], [0, 0, 1, 1], [], []>} : vector<128x128xbf16>, vector<128x128xbf16>, vector<128x128xf32> -> vector<128x128xf32>
    %c0_19 = arith.constant 0 : index
    %c0_20 = arith.constant 0 : index
    %24 = vector.load %arg7[%c0_19, %c0_20] : memref<1x128xf32, #tpu.memory_space<vmem>>, vector<1x128xf32>
    %25 = vector.broadcast %24 : vector<1x128xf32> to vector<128x128xf32>
    %26 = arith.addf %23, %25 : vector<128x128xf32>
    %cst_21 = arith.constant dense<0xFF800000> : vector<128xf32>
    %27 = vector.multi_reduction <maximumf>, %26, %cst_21 [1] : vector<128x128xf32> to vector<128xf32>
    %28 = vector.shape_cast %27 : vector<128xf32> to vector<128x1xf32>
    %29 = vector.broadcast %28 : vector<128x1xf32> to vector<128x128xf32>
    %30 = arith.subf %26, %29 : vector<128x128xf32>
    %31 = math.exp %30 : vector<128x128xf32>
    %cst_22 = arith.constant dense<0.000000e+00> : vector<128xf32>
    %32 = vector.multi_reduction <add>, %31, %cst_22 [1] : vector<128x128xf32> to vector<128xf32>
    %33 = vector.shape_cast %32 : vector<128xf32> to vector<128x1xf32>
    %34 = math.log %33 : vector<128x1xf32>
    %35 = vector.broadcast %34 : vector<128x1xf32> to vector<128x128xf32>
    %36 = arith.subf %30, %35 : vector<128x128xf32>
    %c0_23 = arith.constant 0 : index
    %c0_24 = arith.constant 0 : index
    %37 = vector.load %arg8[%c0_23, %c0_24] : memref<128x128xf32, #tpu.memory_space<vmem>>, vector<128x128xf32>
    tpu.vector_store %arg8[%c0_23, %c0_24], %36 {strides = array<i32>} : memref<128x128xf32, #tpu.memory_space<vmem>>, vector<128x128xf32>,
    return
  }
}

</mosaic_0001>

<bundles_post_ra>
// kernel: gcn_forward.1
= control target key start
LH: loop header
LB: loop body
LE: loop exit
PB: predicated region body
PF: predicated region fallthrough
CT: control target
= control target key end

     0   :  { %vm134_vm0 = vcmask 523264   ;;  %s1810_s2 = inlined_call_operand.vmem [shape: bf16[64,128], index: 2, kind: input, shape index: {}]   ;;  %s1811_s0 = inlined_call_operand.vmem [shape: bf16[128,64], index: 0, kind: input, shape index: {}]   ;;  %s1812_s1 = inlined_call_operand.vmem [shape: bf16[128,128], index: 1, kind: input, shape index: {}]   ;;  %s1813_s4 = inlined_call_operand.vmem [shape: bf16[128,128], index: 4, kind: input, shape index: {}]   ;;  %s1814_s3 = inlined_call_operand.vmem [shape: f32[1,128], index: 3, kind: input, shape index: {}]   ;;  %s1815_s6 = inlined_call_operand.vmem [shape: bf16[128,128], index: 6, kind: input, shape index: {}]   ;;  %s1816_s5 = inlined_call_operand.vmem [shape: f32[1,128], index: 5, kind: input, shape index: {}]   ;;  %s1817_s7 = inlined_call_operand.vmem [shape: f32[1,128], index: 7, kind: input, shape index: {}]   ;;  %s1818_s8 = inlined_call_operand.vmem [shape: f32[128,128], index: 8, kind: output, shape index: {}]  }
   0x1   :  { %v1376_v0 = vld [vmem:[%s1810_s2] sm:$0xff]   ;;  %v1377_v1 = vld [vmem:[%s1810_s2 + $0x8] sm:$0xff]   ;;  %v1378_v2 = vld [vmem:[%s1810_s2 + $0x10] sm:$0xff]  }
   0x2   :  { %1208 = vmatprep.subr.bf16.mxu0 %v1376_v0  ;;  %v1380_v3 = vld [vmem:[%s1811_s0] sm:$0xff]   ;;  %v1379_v4 = vld [vmem:[%s1810_s2 + $0x18] sm:$0xff]   ;;  %v1381_v5 = vld [vmem:[%s1811_s0 + $0x8] sm:$0xff]  }
   0x3   :  { %1209 = vmatpush3.bf16.msra.mxu0 %v1376_v0  ;;  %1216 = vmatprep.mubr.msk.bf16.mxu0 %vm134_vm0, %v1380_v3  ;;  %v1382_v6 = vld [vmem:[%s1811_s0 + $0x10] sm:$0xff]   ;;  %v1383_v7 = vld [vmem:[%s1811_s0 + $0x18] sm:$0xff]   ;;  %v1384_v8 = vld [vmem:[%s1811_s0 + $0x20] sm:$0xff]  }
   0x4   :  { %1210 = vmatprep.subr.bf16.mxu0 %v1377_v1  ;;  %v1385_v9 = vld [vmem:[%s1811_s0 + $0x28] sm:$0xff]   ;;  %v1386_v10 = vld [vmem:[%s1811_s0 + $0x30] sm:$0xff]   ;;  %v1387_v11 = vld [vmem:[%s1811_s0 + $0x38] sm:$0xff]  }
   0x5   :  { %v1568_v12 = vld [vmem:[%s1812_s1] sm:$0xff]   ;;  %v1397_v14 = vld [vmem:[%s1813_s4 + $0x8] sm:$0xff]   ;;  %v1398_v15 = vld [vmem:[%s1813_s4 + $0x10] sm:$0xff]  }
   0x6   :  { %1248 = vmatprep.mubr.bf16.mxu1 %v1568_v12  ;;  %v1396_v13 = vld [vmem:[%s1813_s4] sm:$0xff]   ;;  %v1399_v16 = vld [vmem:[%s1813_s4 + $0x18] sm:$0xff]   ;;  %v1401_v18 = vld [vmem:[%s1813_s4 + $0x28] sm:$0xff]  }
   0x7   :  { %1211 = vmatpush3.bf16.msra.mxu0 %v1377_v1  ;;  %v1400_v17 = vld [vmem:[%s1813_s4 + $0x20] sm:$0xff]   ;;  %v1592_v43 = vld [vmem:[%s1812_s1 + $0x8] sm:$0xff]   ;;  %v1597_v44 = vld [vmem:[%s1812_s1 + $0x10] sm:$0xff]  }
   0x8   :  { %1212 = vmatprep.subr.bf16.mxu0 %v1378_v2  ;;  %v1604_v45 = vld [vmem:[%s1812_s1 + $0x18] sm:$0xff]   ;;  %v1609_v46 = vld [vmem:[%s1812_s1 + $0x20] sm:$0xff]   ;;  %v1616_v47 = vld [vmem:[%s1812_s1 + $0x28] sm:$0xff]  }
   0x9   :  { %v1621_v48 = vld [vmem:[%s1812_s1 + $0x30] sm:$0xff]   ;;  %v1628_v49 = vld [vmem:[%s1812_s1 + $0x38] sm:$0xff]   ;;  %v1105_v52 = vld [vmem:[%s1814_s3] ss:$0 sm:$0xff] }
   0xa   :  { %v1402_v50 = vld [vmem:[%s1813_s4 + $0x30] sm:$0xff]   ;;  %v1403_v51 = vld [vmem:[%s1813_s4 + $0x38] sm:$0xff]  }
   0xb   :  { %1213 = vmatpush3.bf16.msra.mxu0 %v1378_v2 }
   0xc   :  { %1214 = vmatprep.subr.bf16.mxu0 %v1379_v4 }
   0xf   :  { %1215 = vmatpush3.bf16.msra.mxu0 %v1379_v4 }
  0x10   :  { %1264 = vmatprep.subr.bf16.mxu0 %v1396_v13 }
  0x12   :  { %1217 = vmatmul.mubr.msk.bf16.vlgmr.msra.gmra.mrb[0].mxu0 %vm134_vm0, %v1381_v5 }
  0x13   :  { %1220 = vmatprep.mubr.msk.bf16.mxu0 %vm134_vm0, %v1382_v6  ;;  %1265 = vmatpush3.bf16.msra.mxu0 %v1396_v13 }
  0x14   :  { %1266 = vmatprep.subr.bf16.mxu0 %v1397_v14 }
  0x17   :  { %1267 = vmatpush3.bf16.msra.mxu0 %v1397_v14 }
  0x18   :  { %1268 = vmatprep.subr.bf16.mxu0 %v1398_v15 }
  0x1a   :  { %1221 = vmatmul.mubr.msk.bf16.gmra.mrb[4].mxu0 %vm134_vm0, %v1383_v7 }
  0x1b   :  { %1224 = vmatprep.mubr.msk.bf16.mxu0 %vm134_vm0, %v1384_v8  ;;  %1269 = vmatpush3.bf16.msra.mxu0 %v1398_v15 }
  0x1c   :  { %1270 = vmatprep.subr.bf16.mxu0 %v1399_v16 }
  0x1f   :  { %1271 = vmatpush3.bf16.msra.mxu0 %v1399_v16 }
  0x20   :  { %1272 = vmatprep.subr.bf16.mxu0 %v1400_v17 }
  0x22   :  { %1225 = vmatmul.mubr.msk.bf16.gmra.mrb[8].mxu0 %vm134_vm0, %v1385_v9 }
  0x23   :  { %1228 = vmatprep.mubr.msk.bf16.mxu0 %vm134_vm0, %v1386_v10  ;;  %1273 = vmatpush3.bf16.msra.mxu0 %v1400_v17 }
  0x24   :  { %1274 = vmatprep.subr.bf16.mxu0 %v1401_v18 }
  0x27   :  { %1275 = vmatpush3.bf16.msra.mxu0 %v1401_v18 }
  0x28   :  { %1276 = vmatprep.subr.bf16.mxu0 %v1402_v50 }
  0x2a   :  { %1229 = vmatmul.mubr.msk.bf16.gmra.mrb[12].mxu0 %vm134_vm0, %v1387_v11 }
  0x2b   :  { %1277 = vmatpush3.bf16.msra.mxu0 %v1402_v50 }
  0x2c   :  { %1278 = vmatprep.subr.bf16.mxu0 %v1403_v51 }
  0x2f   :  { %1279 = vmatpush3.bf16.msra.mxu0 %v1403_v51 }
  0xe5   :  { %v1218_v19 = vpop.f32.mrb[0].mxu0 }
  0xe6   :  { %v193_v20 = vpop.f32.mrb[1].mxu0 }
  0xe7   :  { %v1219_v21 = vpop.f32.mrb[2].mxu0 }
  0xe8   :  { %v257_v22 = vpack.c.bf16 %v1219_v21, %v1218_v19  ;;  %v196_v23 = vpop.f32.mrb[3].mxu0 }
  0xe9   :  { %v256_v24 = vpack.c.bf16 %v196_v23, %v193_v20 }
  0xeb   :  { %1232 = vmatprep.subr.bf16.mxu1 %v256_v24 }
  0xec   :  { %1233 = vmatpush3.bf16.msra.mxu1 %v256_v24 }
  0xed   :  { %v1222_v25 = vpop.f32.mrb[4].mxu0  ;;  %1234 = vmatprep.subr.bf16.mxu1 %v257_v22 }
  0xee   :  { %v209_v26 = vpop.f32.mrb[5].mxu0 }
  0xef   :  { %v1223_v27 = vpop.f32.mrb[6].mxu0 }
  0xf0   :  { %v259_v28 = vpack.c.bf16 %v1223_v27, %v1222_v25  ;;  %v212_v29 = vpop.f32.mrb[7].mxu0  ;;  %1235 = vmatpush3.bf16.msra.mxu1 %v257_v22 }
  0xf1   :  { %v258_v30 = vpack.c.bf16 %v212_v29, %v209_v26 }
  0xf3   :  { %1236 = vmatprep.subr.bf16.mxu1 %v258_v30 }
  0xf4   :  { %1237 = vmatpush3.bf16.msra.mxu1 %v258_v30 }
  0xf5   :  { %v1226_v31 = vpop.f32.mrb[8].mxu0  ;;  %1238 = vmatprep.subr.bf16.mxu1 %v259_v28 }
  0xf6   :  { %v225_v32 = vpop.f32.mrb[9].mxu0 }
  0xf7   :  { %v1227_v33 = vpop.f32.mrb[10].mxu0 }
  0xf8   :  { %v261_v34 = vpack.c.bf16 %v1227_v33, %v1226_v31  ;;  %v228_v35 = vpop.f32.mrb[11].mxu0  ;;  %1239 = vmatpush3.bf16.msra.mxu1 %v259_v28 }
  0xf9   :  { %v260_v36 = vpack.c.bf16 %v228_v35, %v225_v32 }
  0xfb   :  { %1240 = vmatprep.subr.bf16.mxu1 %v260_v36 }
  0xfc   :  { %1241 = vmatpush3.bf16.msra.mxu1 %v260_v36 }
  0xfd   :  { %v1230_v37 = vpop.f32.mrb[12].mxu0  ;;  %1242 = vmatprep.subr.bf16.mxu1 %v261_v34 }
  0xfe   :  { %v241_v38 = vpop.f32.mrb[13].mxu0 }
  0xff   :  { %v1231_v39 = vpop.f32.mrb[14].mxu0 }
 0x100   :  { %v263_v40 = vpack.c.bf16 %v1231_v39, %v1230_v37  ;;  %v244_v41 = vpop.f32.mrb[15].mxu0  ;;  %1243 = vmatpush3.bf16.msra.mxu1 %v261_v34 }
 0x101   :  { %v262_v42 = vpack.c.bf16 %v244_v41, %v241_v38 }
 0x103   :  { %1244 = vmatprep.subr.bf16.mxu1 %v262_v42 }
 0x104   :  { %1245 = vmatpush3.bf16.msra.mxu1 %v262_v42 }
 0x105   :  { %1246 = vmatprep.subr.bf16.mxu1 %v263_v40 }
 0x108   :  { %1247 = vmatpush3.bf16.msra.mxu1 %v263_v40 }
 0x10b   :  { %1249 = vmatmul.mubr.bf16.vlgmr.msra.gmra.mrb[0].mxu1 %v1592_v43 }
 0x10c   :  { %1252 = vmatprep.mubr.bf16.mxu1 %v1597_v44 }
 0x113   :  { %1253 = vmatmul.mubr.bf16.gmra.mrb[4].mxu1 %v1604_v45 }
 0x114   :  { %1256 = vmatprep.mubr.bf16.mxu1 %v1609_v46 }
 0x11b   :  { %1257 = vmatmul.mubr.bf16.gmra.mrb[8].mxu1 %v1616_v47 }
 0x11c   :  { %1260 = vmatprep.mubr.bf16.mxu1 %v1621_v48 }
 0x123   :  { %1261 = vmatmul.mubr.bf16.gmra.mrb[12].mxu1 %v1628_v49 }
 0x124   :  { %1312 = vmatprep.mubr.bf16.mxu1 %v1568_v12 }
 0x1de   :  { %v1250_v53 = vpop.f32.mrb[0].mxu1 }
 0x1df   :  { %v362_v54 = vadd.f32 %v1250_v53, %v1105_v52  ;;  %v353_v55 = vpop.f32.mrb[1].mxu1  ;;  %v1404_v53 = vld [vmem:[%s1815_s6] sm:$0xff]  }
 0x1e0   :  { %v354_v56 = vadd.f32 %v1105_v52, %v353_v55  ;;  %v1251_v57 = vpop.f32.mrb[2].mxu1  ;;  %1328 = vmatprep.subr.bf16.mxu0 %v1404_v53  ;;  %v1407_v55 = vld [vmem:[%s1815_s6 + $0x18] sm:$0xff]  }
 0x1e1   :  { %v365_v58 = vadd.f32 %v1251_v57, %v1105_v52  ;;  %v356_v59 = vpop.f32.mrb[3].mxu1  ;;  %v418_v61 = vmax.f32 %v362_v54, 0.0  ;;  %v1405_v54 = vld [vmem:[%s1815_s6 + $0x8] sm:$0xff]  }
 0x1e2   :  { %v357_v60 = vadd.f32 %v1105_v52, %v356_v59  ;;  %v416_v63 = vmax.f32 %v354_v56, 0.0  ;;  %v1408_v56 = vld [vmem:[%s1815_s6 + $0x20] sm:$0xff]   ;;  %v1409_v57 = vld [vmem:[%s1815_s6 + $0x28] sm:$0xff]  }
 0x1e3   :  { %v419_v62 = vmax.f32 %v365_v58, 0.0 }
 0x1e4   :  { %v417_v0 = vmax.f32 %v357_v60, 0.0 }
 0x1e5   :  { %v433_v1 = vpack.c.bf16 %v419_v62, %v418_v61 }
 0x1e6   :  { %v432_v2 = vpack.c.bf16 %v417_v0, %v416_v63  ;;  %v1254_v3 = vpop.f32.mrb[4].mxu1 }
 0x1e7   :  { %v378_v4 = vadd.f32 %v1254_v3, %v1105_v52  ;;  %v369_v5 = vpop.f32.mrb[5].mxu1 }
 0x1e8   :  { %v370_v6 = vadd.f32 %v1105_v52, %v369_v5  ;;  %v1255_v7 = vpop.f32.mrb[6].mxu1  ;;  %1280 = vmatprep.mubr.bf16.mxu0 %v432_v2 }
 0x1e9   :  { %v381_v8 = vadd.f32 %v1255_v7, %v1105_v52  ;;  %v372_v9 = vpop.f32.mrb[7].mxu1  ;;  %1281 = vmatmul.mubr.bf16.vlgmr.msra.gmra.mrb[16].mxu0 %v433_v1  ;;  %v422_v11 = vmax.f32 %v378_v4, 0.0 }
 0x1ea   :  { %v373_v10 = vadd.f32 %v1105_v52, %v372_v9  ;;  %v420_v13 = vmax.f32 %v370_v6, 0.0  ;;  %1329 = vmatpush3.bf16.msra.mxu0 %v1404_v53 }
 0x1eb   :  { %v423_v12 = vmax.f32 %v381_v8, 0.0  ;;  %1330 = vmatprep.subr.bf16.mxu0 %v1405_v54 }
 0x1ec   :  { %v421_v14 = vmax.f32 %v373_v10, 0.0 }
 0x1ed   :  { %v435_v15 = vpack.c.bf16 %v423_v12, %v422_v11 }
 0x1ee   :  { %v434_v16 = vpack.c.bf16 %v421_v14, %v420_v13  ;;  %v1258_v17 = vpop.f32.mrb[8].mxu1  ;;  %1331 = vmatpush3.bf16.msra.mxu0 %v1405_v54 }
 0x1ef   :  { %v394_v18 = vadd.f32 %v1258_v17, %v1105_v52  ;;  %v385_v19 = vpop.f32.mrb[9].mxu1 }
 0x1f0   :  { %v386_v20 = vadd.f32 %v1105_v52, %v385_v19  ;;  %v1259_v21 = vpop.f32.mrb[10].mxu1  ;;  %1284 = vmatprep.mubr.bf16.mxu0 %v434_v16 }
 0x1f1   :  { %v397_v22 = vadd.f32 %v1259_v21, %v1105_v52  ;;  %v388_v23 = vpop.f32.mrb[11].mxu1  ;;  %1285 = vmatmul.mubr.bf16.gmra.mrb[20].mxu0 %v435_v15  ;;  %v426_v25 = vmax.f32 %v394_v18, 0.0 }
 0x1f2   :  { %v389_v24 = vadd.f32 %v1105_v52, %v388_v23  ;;  %v424_v27 = vmax.f32 %v386_v20, 0.0 }
 0x1f3   :  { %v427_v26 = vmax.f32 %v397_v22, 0.0 }
 0x1f4   :  { %v425_v28 = vmax.f32 %v389_v24, 0.0 }
 0x1f5   :  { %v437_v29 = vpack.c.bf16 %v427_v26, %v426_v25 }
 0x1f6   :  { %v436_v30 = vpack.c.bf16 %v425_v28, %v424_v27  ;;  %v1262_v31 = vpop.f32.mrb[12].mxu1 }
 0x1f7   :  { %v410_v32 = vadd.f32 %v1262_v31, %v1105_v52  ;;  %v401_v33 = vpop.f32.mrb[13].mxu1 }
 0x1f8   :  { %v402_v34 = vadd.f32 %v1105_v52, %v401_v33  ;;  %v1263_v35 = vpop.f32.mrb[14].mxu1  ;;  %1288 = vmatprep.mubr.bf16.mxu0 %v436_v30 }
 0x1f9   :  { %v413_v36 = vadd.f32 %v1263_v35, %v1105_v52  ;;  %v404_v37 = vpop.f32.mrb[15].mxu1  ;;  %1289 = vmatmul.mubr.bf16.gmra.mrb[24].mxu0 %v437_v29  ;;  %v430_v39 = vmax.f32 %v410_v32, 0.0 }
 0x1fa   :  { %v405_v38 = vadd.f32 %v1105_v52, %v404_v37  ;;  %v428_v41 = vmax.f32 %v402_v34, 0.0  ;;  %v1406_v52 = vld [vmem:[%s1815_s6 + $0x10] sm:$0xff]  }
 0x1fb   :  { %v431_v40 = vmax.f32 %v413_v36, 0.0  ;;  %1332 = vmatprep.subr.bf16.mxu0 %v1406_v52 }
 0x1fc   :  { %v429_v42 = vmax.f32 %v405_v38, 0.0  ;;  %1333 = vmatpush3.bf16.msra.mxu0 %v1406_v52 }
 0x1fd   :  { %v439_v50 = vpack.c.bf16 %v431_v40, %v430_v39  ;;  %1334 = vmatprep.subr.bf16.mxu0 %v1407_v55 }
 0x1fe   :  { %v438_v51 = vpack.c.bf16 %v429_v42, %v428_v41 }
 0x200   :  { %1292 = vmatprep.mubr.bf16.mxu0 %v438_v51  ;;  %1335 = vmatpush3.bf16.msra.mxu0 %v1407_v55 }
 0x201   :  { %1293 = vmatmul.mubr.bf16.gmra.mrb[28].mxu0 %v439_v50  ;;  %1336 = vmatprep.subr.bf16.mxu0 %v1408_v56 }
 0x204   :  { %1337 = vmatpush3.bf16.msra.mxu0 %v1408_v56 }
 0x205   :  { %1338 = vmatprep.subr.bf16.mxu0 %v1409_v57 }
 0x208   :  { %1339 = vmatpush3.bf16.msra.mxu0 %v1409_v57 }
 0x2bc   :  { %v1282_v58 = vpop.f32.mrb[16].mxu0 }
 0x2bd   :  { %v538_v59 = vpop.f32.mrb[17].mxu0 }
 0x2be   :  { %v1283_v60 = vpop.f32.mrb[18].mxu0 }
 0x2bf   :  { %v602_v61 = vpack.c.bf16 %v1283_v60, %v1282_v58  ;;  %v541_v62 = vpop.f32.mrb[19].mxu0 }
 0x2c0   :  { %v601_v63 = vpack.c.bf16 %v541_v62, %v538_v59 }
 0x2c2   :  { %1296 = vmatprep.subr.bf16.mxu1 %v601_v63 }
 0x2c3   :  { %1297 = vmatpush3.bf16.msra.mxu1 %v601_v63 }
 0x2c4   :  { %v1286_v0 = vpop.f32.mrb[20].mxu0  ;;  %1298 = vmatprep.subr.bf16.mxu1 %v602_v61 }
 0x2c5   :  { %v554_v1 = vpop.f32.mrb[21].mxu0 }
 0x2c6   :  { %v1287_v2 = vpop.f32.mrb[22].mxu0 }
 0x2c7   :  { %v604_v3 = vpack.c.bf16 %v1287_v2, %v1286_v0  ;;  %v557_v4 = vpop.f32.mrb[23].mxu0  ;;  %1299 = vmatpush3.bf16.msra.mxu1 %v602_v61 }
 0x2c8   :  { %v603_v5 = vpack.c.bf16 %v557_v4, %v554_v1 }
 0x2ca   :  { %1300 = vmatprep.subr.bf16.mxu1 %v603_v5 }
 0x2cb   :  { %1301 = vmatpush3.bf16.msra.mxu1 %v603_v5 }
 0x2cc   :  { %v1290_v6 = vpop.f32.mrb[24].mxu0  ;;  %1302 = vmatprep.subr.bf16.mxu1 %v604_v3 }
 0x2cd   :  { %v570_v7 = vpop.f32.mrb[25].mxu0 }
 0x2ce   :  { %v1291_v8 = vpop.f32.mrb[26].mxu0 }
 0x2cf   :  { %v606_v9 = vpack.c.bf16 %v1291_v8, %v1290_v6  ;;  %v573_v10 = vpop.f32.mrb[27].mxu0  ;;  %1303 = vmatpush3.bf16.msra.mxu1 %v604_v3 }
 0x2d0   :  { %v605_v11 = vpack.c.bf16 %v573_v10, %v570_v7 }
 0x2d2   :  { %1304 = vmatprep.subr.bf16.mxu1 %v605_v11 }
 0x2d3   :  { %1305 = vmatpush3.bf16.msra.mxu1 %v605_v11 }
 0x2d4   :  { %v1294_v12 = vpop.f32.mrb[28].mxu0  ;;  %1306 = vmatprep.subr.bf16.mxu1 %v606_v9 }
 0x2d5   :  { %v586_v13 = vpop.f32.mrb[29].mxu0 }
 0x2d6   :  { %v1295_v14 = vpop.f32.mrb[30].mxu0 }
 0x2d7   :  { %v608_v15 = vpack.c.bf16 %v1295_v14, %v1294_v12  ;;  %v589_v16 = vpop.f32.mrb[31].mxu0  ;;  %1307 = vmatpush3.bf16.msra.mxu1 %v606_v9 }
 0x2d8   :  { %v607_v17 = vpack.c.bf16 %v589_v16, %v586_v13  ;;  %v1123_v13 = vld [vmem:[%s1817_s7] ss:$0 sm:$0xff] }
 0x2da   :  { %1308 = vmatprep.subr.bf16.mxu1 %v607_v17 }
 0x2db   :  { %1309 = vmatpush3.bf16.msra.mxu1 %v607_v17 }
 0x2dc   :  { %1310 = vmatprep.subr.bf16.mxu1 %v608_v15 }
 0x2df   :  { %1311 = vmatpush3.bf16.msra.mxu1 %v608_v15 }
 0x2e0   :  { %1360 = vmatprep.subr.bf16.mxu1 %v1404_v53 }
 0x2e2   :  { %1313 = vmatmul.mubr.bf16.vlgmr.msra.gmra.mrb[16].mxu1 %v1592_v43  ;;  %v1410_v43 = vld [vmem:[%s1815_s6 + $0x30] sm:$0xff]  }
 0x2e3   :  { %1316 = vmatprep.mubr.bf16.mxu1 %v1597_v44  ;;  %1368 = vmatpush3.bf16.msra.mxu1 %v1404_v53  ;;  %v1411_v44 = vld [vmem:[%s1815_s6 + $0x38] sm:$0xff]  }
 0x2e4   :  { %1361 = vmatprep.subr.bf16.mxu1 %v1405_v54  ;;  %1340 = vmatprep.subr.bf16.mxu0 %v1410_v43 }
 0x2e5   :  { %1341 = vmatpush3.bf16.msra.mxu0 %v1410_v43 }
 0x2e6   :  { %1342 = vmatprep.subr.bf16.mxu0 %v1411_v44 }
 0x2e7   :  { %1369 = vmatpush3.bf16.msra.mxu1 %v1405_v54 }
 0x2e8   :  { %1362 = vmatprep.subr.bf16.mxu1 %v1406_v52 }
 0x2e9   :  { %1343 = vmatpush3.bf16.msra.mxu0 %v1411_v44 }
 0x2ea   :  { %1317 = vmatmul.mubr.bf16.gmra.mrb[20].mxu1 %v1604_v45  ;;  %v1122_v45 = vld [vmem:[%s1816_s5] ss:$0 sm:$0xff] }
 0x2eb   :  { %1320 = vmatprep.mubr.bf16.mxu1 %v1609_v46  ;;  %1370 = vmatpush3.bf16.msra.mxu1 %v1406_v52 }
 0x2ec   :  { %1363 = vmatprep.subr.bf16.mxu1 %v1407_v55 }
 0x2ef   :  { %1371 = vmatpush3.bf16.msra.mxu1 %v1407_v55 }
 0x2f0   :  { %1364 = vmatprep.subr.bf16.mxu1 %v1408_v56 }
 0x2f2   :  { %1321 = vmatmul.mubr.bf16.gmra.mrb[24].mxu1 %v1616_v47 }
 0x2f3   :  { %1324 = vmatprep.mubr.bf16.mxu1 %v1621_v48  ;;  %1372 = vmatpush3.bf16.msra.mxu1 %v1408_v56 }
 0x2f4   :  { %1365 = vmatprep.subr.bf16.mxu1 %v1409_v57 }
 0x2f7   :  { %1373 = vmatpush3.bf16.msra.mxu1 %v1409_v57 }
 0x2f8   :  { %1366 = vmatprep.subr.bf16.mxu1 %v1410_v43 }
 0x2fa   :  { %1325 = vmatmul.mubr.bf16.gmra.mrb[28].mxu1 %v1628_v49 }
 0x2fb   :  { %1374 = vmatpush3.bf16.msra.mxu1 %v1410_v43 }
 0x2fc   :  { %1367 = vmatprep.subr.bf16.mxu1 %v1411_v44 }
 0x2ff   :  { %1375 = vmatpush3.bf16.msra.mxu1 %v1411_v44 }
 0x3b5   :  { %v1314_v46 = vpop.f32.mrb[16].mxu1 }
 0x3b6   :  { %v659_v47 = vadd.f32 %v1314_v46, %v1122_v45  ;;  %v650_v48 = vpop.f32.mrb[17].mxu1 }
 0x3b7   :  { %v651_v49 = vadd.f32 %v1122_v45, %v650_v48  ;;  %v1315_v18 = vpop.f32.mrb[18].mxu1 }
 0x3b8   :  { %v662_v19 = vadd.f32 %v1315_v18, %v1122_v45  ;;  %v653_v20 = vpop.f32.mrb[19].mxu1  ;;  %v715_v22 = vmax.f32 %v659_v47, 0.0 }
 0x3b9   :  { %v654_v21 = vadd.f32 %v1122_v45, %v653_v20  ;;  %v713_v24 = vmax.f32 %v651_v49, 0.0 }
 0x3ba   :  { %v716_v23 = vmax.f32 %v662_v19, 0.0 }
 0x3bb   :  { %v714_v25 = vmax.f32 %v654_v21, 0.0 }
 0x3bc   :  { %v730_v26 = vpack.c.bf16 %v716_v23, %v715_v22 }
 0x3bd   :  { %v729_v27 = vpack.c.bf16 %v714_v25, %v713_v24  ;;  %v1318_v28 = vpop.f32.mrb[20].mxu1 }
 0x3be   :  { %v675_v29 = vadd.f32 %v1318_v28, %v1122_v45  ;;  %v666_v30 = vpop.f32.mrb[21].mxu1 }
 0x3bf   :  { %v667_v31 = vadd.f32 %v1122_v45, %v666_v30  ;;  %v1319_v32 = vpop.f32.mrb[22].mxu1  ;;  %1344 = vmatprep.mubr.bf16.mxu0 %v729_v27 }
 0x3c0   :  { %v719_v33 = vmax.f32 %v675_v29, 0.0  ;;  %v678_v34 = vadd.f32 %v1319_v32, %v1122_v45  ;;  %v669_v35 = vpop.f32.mrb[23].mxu1  ;;  %1345 = vmatmul.mubr.bf16.vlgmr.msra.gmra.mrb[32].mxu0 %v730_v26 }
 0x3c1   :  { %v670_v36 = vadd.f32 %v1122_v45, %v669_v35  ;;  %v717_v38 = vmax.f32 %v667_v31, 0.0 }
 0x3c2   :  { %v720_v37 = vmax.f32 %v678_v34, 0.0 }
 0x3c3   :  { %v718_v39 = vmax.f32 %v670_v36, 0.0 }
 0x3c4   :  { %v732_v40 = vpack.c.bf16 %v720_v37, %v719_v33 }
 0x3c5   :  { %v731_v41 = vpack.c.bf16 %v718_v39, %v717_v38  ;;  %v1322_v42 = vpop.f32.mrb[24].mxu1 }
 0x3c6   :  { %v691_v50 = vadd.f32 %v1322_v42, %v1122_v45  ;;  %v682_v51 = vpop.f32.mrb[25].mxu1 }
 0x3c7   :  { %v683_v53 = vadd.f32 %v1122_v45, %v682_v51  ;;  %v1323_v54 = vpop.f32.mrb[26].mxu1  ;;  %1348 = vmatprep.mubr.bf16.mxu0 %v731_v41 }
 0x3c8   :  { %v723_v52 = vmax.f32 %v691_v50, 0.0  ;;  %v694_v55 = vadd.f32 %v1323_v54, %v1122_v45  ;;  %v685_v56 = vpop.f32.mrb[27].mxu1  ;;  %1349 = vmatmul.mubr.bf16.gmra.mrb[36].mxu0 %v732_v40 }
 0x3c9   :  { %v686_v57 = vadd.f32 %v1122_v45, %v685_v56  ;;  %v721_v59 = vmax.f32 %v683_v53, 0.0 }
 0x3ca   :  { %v724_v58 = vmax.f32 %v694_v55, 0.0 }
 0x3cb   :  { %v722_v60 = vmax.f32 %v686_v57, 0.0 }
 0x3cc   :  { %v734_v61 = vpack.c.bf16 %v724_v58, %v723_v52 }
 0x3cd   :  { %v733_v62 = vpack.c.bf16 %v722_v60, %v721_v59  ;;  %v1326_v63 = vpop.f32.mrb[28].mxu1 }
 0x3ce   :  { %v707_v0 = vadd.f32 %v1326_v63, %v1122_v45  ;;  %v698_v1 = vpop.f32.mrb[29].mxu1 }
 0x3cf   :  { %v699_v2 = vadd.f32 %v1122_v45, %v698_v1  ;;  %v1327_v3 = vpop.f32.mrb[30].mxu1  ;;  %1352 = vmatprep.mubr.bf16.mxu0 %v733_v62 }
 0x3d0   :  { %v727_v4 = vmax.f32 %v707_v0, 0.0  ;;  %v710_v5 = vadd.f32 %v1327_v3, %v1122_v45  ;;  %v701_v6 = vpop.f32.mrb[31].mxu1  ;;  %1353 = vmatmul.mubr.bf16.gmra.mrb[40].mxu0 %v734_v61 }
 0x3d1   :  { %v702_v7 = vadd.f32 %v1122_v45, %v701_v6  ;;  %v725_v9 = vmax.f32 %v699_v2, 0.0 }
 0x3d2   :  { %v728_v8 = vmax.f32 %v710_v5, 0.0 }
 0x3d3   :  { %v726_v10 = vmax.f32 %v702_v7, 0.0 }
 0x3d4   :  { %v736_v11 = vpack.c.bf16 %v728_v8, %v727_v4 }
 0x3d5   :  { %v735_v12 = vpack.c.bf16 %v726_v10, %v725_v9 }
 0x3d7   :  { %1356 = vmatprep.mubr.bf16.mxu1 %v735_v12 }
 0x3d8   :  { %1357 = vmatmul.mubr.bf16.vlgmr.msra.gmra.mrb[32].mxu1 %v736_v11 }
 0x493   :  { %v1346_v14 = vpop.f32.mrb[32].mxu0 }
 0x494   :  { %v851_v15 = vadd.f32 %v1346_v14, %v1123_v13  ;;  %v842_v16 = vpop.f32.mrb[33].mxu0 }
 0x495   :  { %v843_v17 = vadd.f32 %v1123_v13, %v842_v16  ;;  %v1347_v43 = vpop.f32.mrb[34].mxu0 }
 0x496   :  { %909 = vmax.xlane.f32.xlu1 %v851_v15  ;;  %v845_v44 = vpop.f32.mrb[35].mxu0  ;;  %v854_v45 = vadd.f32 %v1347_v43, %v1123_v13 }
 0x497   :  { %905 = vmax.xlane.f32.xlu0 %v843_v17  ;;  %v846_v46 = vadd.f32 %v1123_v13, %v845_v44 }
 0x49a   :  { %911 = vmax.xlane.f32.xlu1 %v854_v45 }
 0x49b   :  { %v1350_v47 = vpop.f32.mrb[36].mxu0  ;;  %907 = vmax.xlane.f32.xlu0 %v846_v46 }
 0x49c   :  { %v867_v48 = vadd.f32 %v1350_v47, %v1123_v13  ;;  %v858_v49 = vpop.f32.mrb[37].mxu0 }
 0x49d   :  { %v1351_v18 = vpop.f32.mrb[38].mxu0  ;;  %v859_v21 = vadd.f32 %v1123_v13, %v858_v49 }
 0x49e   :  { %v870_v19 = vadd.f32 %v1351_v18, %v1123_v13  ;;  %v861_v20 = vpop.f32.mrb[39].mxu0 }
 0x49f   :  { %917 = vmax.xlane.f32.xlu0 %v867_v48  ;;  %v862_v22 = vadd.f32 %v1123_v13, %v861_v20 }
 0x4a0   :  { %919 = vmax.xlane.f32.xlu1 %v870_v19 }
 0x4a3   :  { %v1354_v23 = vpop.f32.mrb[40].mxu0  ;;  %913 = vmax.xlane.f32.xlu0 %v859_v21 }
 0x4a4   :  { %v883_v24 = vadd.f32 %v1354_v23, %v1123_v13  ;;  %v874_v25 = vpop.f32.mrb[41].mxu0  ;;  %915 = vmax.xlane.f32.xlu1 %v862_v22 }
 0x4a5   :  { %v1355_v26 = vpop.f32.mrb[42].mxu0  ;;  %v875_v29 = vadd.f32 %v1123_v13, %v874_v25 }
 0x4a6   :  { %v886_v27 = vadd.f32 %v1355_v26, %v1123_v13  ;;  %v877_v28 = vpop.f32.mrb[43].mxu0 }
 0x4a7   :  { %925 = vmax.xlane.f32.xlu0 %v883_v24  ;;  %v1678_v30 = vadd.f32 %v1123_v13, %v877_v28 }
 0x4a8   :  { %927 = vmax.xlane.f32.xlu1 %v886_v27 }
 0x4ab   :  { %v1358_v31 = vpop.f32.mrb[32].mxu1  ;;  %921 = vmax.xlane.f32.xlu0 %v875_v29 }
 0x4ac   :  { %v890_v32 = vpop.f32.mrb[33].mxu1  ;;  %923 = vmax.xlane.f32.xlu1 %v1678_v30  ;;  %v1686_v37 = vadd.f32 %v1358_v31, %v1123_v13 }
 0x4ad   :  { %v1681_v33 = vadd.f32 %v1123_v13, %v890_v32  ;;  %v1359_v34 = vpop.f32.mrb[34].mxu1 }
 0x4ae   :  { %v893_v35 = vpop.f32.mrb[35].mxu1  ;;  %v1689_v38 = vadd.f32 %v1359_v34, %v1123_v13 }
 0x4af   :  { %v1683_v36 = vadd.f32 %v1123_v13, %v893_v35  ;;  %929 = vmax.xlane.f32.xlu0 %v1681_v33 }
 0x4b1   :  { %931 = vmax.xlane.f32.xlu1 %v1683_v36 }
 0x4b3   :  { %933 = vmax.xlane.f32.xlu0 %v1686_v37 }
 0x4b5   :  { %935 = vmax.xlane.f32.xlu1 %v1689_v38 }
 0x523   :  { %v910_v39 = vpop.xlane.xlu1 %909 }
 0x524   :  { %v1693_v40 = vsub.f32 %v851_v15, %v910_v39  ;;  %v906_v41 = vpop.xlane.xlu0 %905 }
 0x525   :  { %v1695_v42 = vsub.f32 %v843_v17, %v906_v41 }
 0x526   :  { %v957_v50 = vmul.f32 1.442695, %v1693_v40 }
 0x527   :  { %v953_v51 = vmul.f32 1.442695, %v1695_v42  ;;  %v912_v53 = vpop.xlane.xlu1 %911 }
 0x528   :  { %1412 = vpow2.f32 %v957_v50  ;;  %v1699_v54 = vsub.f32 %v854_v45, %v912_v53  ;;  %v908_v52 = vpop.xlane.xlu0 %907 }
 0x529   :  { %v1701_v55 = vsub.f32 %v846_v46, %v908_v52  ;;  %1414 = vpow2.f32 %v953_v51 }
 0x52a   :  { %v959_v56 = vmul.f32 1.442695, %v1699_v54 }
 0x52b   :  { %v955_v57 = vmul.f32 1.442695, %v1701_v55 }
 0x52c   :  { %1416 = vpow2.f32 %v959_v56  ;;  %v918_v58 = vpop.xlane.xlu0 %917 }
 0x52d   :  { %v1705_v59 = vsub.f32 %v867_v48, %v918_v58  ;;  %v920_v60 = vpop.xlane.xlu1 %919  ;;  %1418 = vpow2.f32 %v955_v57 }
 0x52e   :  { %v1707_v61 = vsub.f32 %v870_v19, %v920_v60 }
 0x52f   :  { %v965_v62 = vmul.f32 1.442695, %v1705_v59 }
 0x530   :  { %v967_v63 = vmul.f32 1.442695, %v1707_v61  ;;  %v914_v0 = vpop.xlane.xlu0 %913 }
 0x531   :  { %1420 = vpow2.f32 %v965_v62  ;;  %v1711_v1 = vsub.f32 %v859_v21, %v914_v0  ;;  %v916_v2 = vpop.xlane.xlu1 %915 }
 0x532   :  { %v1413_v3 = vpop.eup %1412  ;;  %v1713_v4 = vsub.f32 %v862_v22, %v916_v2  ;;  %1422 = vpow2.f32 %v967_v63 }
 0x533   :  { %v961_v5 = vmul.f32 1.442695, %v1711_v1  ;;  %989 = vadd.xlane.f32.xlu0 %v1413_v3  ;;  %v1415_v8 = vpop.eup %1414 }
 0x534   :  { %v963_v6 = vmul.f32 1.442695, %v1713_v4  ;;  %v926_v7 = vpop.xlane.xlu0 %925 }
 0x535   :  { %1424 = vpow2.f32 %v961_v5  ;;  %v1717_v9 = vsub.f32 %v883_v24, %v926_v7  ;;  %v928_v10 = vpop.xlane.xlu1 %927 }
 0x536   :  { %v1417_v11 = vpop.eup %1416  ;;  %v1719_v12 = vsub.f32 %v886_v27, %v928_v10  ;;  %1426 = vpow2.f32 %v963_v6 }
 0x537   :  { %v973_v13 = vmul.f32 1.442695, %v1717_v9  ;;  %991 = vadd.xlane.f32.xlu1 %v1417_v11  ;;  %985 = vadd.xlane.f32.xlu0 %v1415_v8  ;;  %v1419_v43 = vpop.eup %1418 }
 0x538   :  { %v975_v14 = vmul.f32 1.442695, %v1719_v12  ;;  %v922_v15 = vpop.xlane.xlu0 %921 }
 0x539   :  { %1428 = vpow2.f32 %v973_v13  ;;  %v1723_v16 = vsub.f32 %v875_v29, %v922_v15  ;;  %v924_v17 = vpop.xlane.xlu1 %923 }
 0x53a   :  { %v1726_v44 = vsub.f32 %v1678_v30, %v924_v17  ;;  %1430 = vpow2.f32 %v975_v14 }
 0x53b   :  { %v1421_v45 = vpop.eup %1420  ;;  %v969_v46 = vmul.f32 1.442695, %v1723_v16  ;;  %987 = vadd.xlane.f32.xlu1 %v1419_v43 }
 0x53c   :  { %v971_v47 = vmul.f32 1.442695, %v1726_v44  ;;  %997 = vadd.xlane.f32.xlu0 %v1421_v45  ;;  %v930_v48 = vpop.xlane.xlu0 %929  ;;  %v1423_v18 = vpop.eup %1422 }
 0x53d   :  { %1432 = vpow2.f32 %v969_v46  ;;  %v1731_v49 = vsub.f32 %v1681_v33, %v930_v48 }
 0x53e   :  { %v932_v19 = vpop.xlane.xlu1 %931  ;;  %1434 = vpow2.f32 %v971_v47 }
 0x53f   :  { %v1425_v20 = vpop.eup %1424  ;;  %v977_v21 = vmul.f32 1.442695, %v1731_v49  ;;  %v1735_v22 = vsub.f32 %v1683_v36, %v932_v19  ;;  %999 = vadd.xlane.f32.xlu1 %v1423_v18 }
 0x540   :  { %993 = vadd.xlane.f32.xlu0 %v1425_v20  ;;  %v934_v23 = vpop.xlane.xlu0 %933  ;;  %v1427_v26 = vpop.eup %1426 }
 0x541   :  { %1436 = vpow2.f32 %v977_v21  ;;  %v979_v24 = vmul.f32 1.442695, %v1735_v22  ;;  %v1739_v25 = vsub.f32 %v1686_v37, %v934_v23 }
 0x542   :  { %v936_v27 = vpop.xlane.xlu1 %935 }
 0x543   :  { %v1429_v28 = vpop.eup %1428  ;;  %1438 = vpow2.f32 %v979_v24  ;;  %v981_v29 = vmul.f32 1.442695, %v1739_v25  ;;  %v1743_v30 = vsub.f32 %v1689_v38, %v936_v27  ;;  %995 = vadd.xlane.f32.xlu1 %v1427_v26 }
 0x544   :  { %1005 = vadd.xlane.f32.xlu0 %v1429_v28  ;;  %v1431_v32 = vpop.eup %1430 }
 0x545   :  { %1440 = vpow2.f32 %v981_v29  ;;  %v983_v31 = vmul.f32 1.442695, %v1743_v30 }
 0x547   :  { %v1433_v33 = vpop.eup %1432  ;;  %1442 = vpow2.f32 %v983_v31  ;;  %1007 = vadd.xlane.f32.xlu1 %v1431_v32 }
 0x548   :  { %1001 = vadd.xlane.f32.xlu0 %v1433_v33  ;;  %v1435_v34 = vpop.eup %1434 }
 0x54b   :  { %v1437_v35 = vpop.eup %1436  ;;  %1003 = vadd.xlane.f32.xlu1 %v1435_v34 }
 0x54c   :  { %1009 = vadd.xlane.f32.xlu0 %v1437_v35 }
 0x54d   :  { %v1439_v36 = vpop.eup %1438 }
 0x54f   :  { %v1441_v37 = vpop.eup %1440  ;;  %1011 = vadd.xlane.f32.xlu1 %v1439_v36 }
 0x550   :  { %1013 = vadd.xlane.f32.xlu0 %v1441_v37 }
 0x551   :  { %v1443_v38 = vpop.eup %1442 }
 0x553   :  { %1015 = vadd.xlane.f32.xlu1 %v1443_v38 }
 0x5c0   :  { %v990_v39 = vpop.xlane.xlu0 %989 }
 0x5c1   :  { %1444 = vlog2.f32 %v990_v39 }
 0x5c4   :  { %v992_v41 = vpop.xlane.xlu1 %991  ;;  %v986_v50 = vpop.xlane.xlu0 %985 }
 0x5c5   :  { %1446 = vlog2.f32 %v992_v41 }
 0x5c6   :  { %1448 = vlog2.f32 %v986_v50 }
 0x5c8   :  { %v988_v51 = vpop.xlane.xlu1 %987 }
 0x5c9   :  { %1450 = vlog2.f32 %v988_v51  ;;  %v998_v53 = vpop.xlane.xlu0 %997 }
 0x5ca   :  { %1452 = vlog2.f32 %v998_v53 }
 0x5cb   :  { %v1445_v52 = vpop.eup %1444 }
 0x5cc   :  { %v1022_v56 = vmul.f32 0.6931472, %v1445_v52  ;;  %v1000_v57 = vpop.xlane.xlu1 %999 }
 0x5cd   :  { %1454 = vlog2.f32 %v1000_v57  ;;  %v994_v58 = vpop.xlane.xlu0 %993 }
 0x5ce   :  { %v1051_v60 = vsub.f32 %v1693_v40, %v1022_v56  ;;  %1456 = vlog2.f32 %v994_v58 }
 0x5cf   :  { %v1447_v62 = vpop.eup %1446 }
 0x5d0   :  { %v1449_v63 = vpop.eup %1448  ;;  %1067 = vst [vmem:[%s1818_s8 + $0x10] sm:$0xff] %v1051_v60  ;;  %v1024_v0 = vmul.f32 0.6931472, %v1447_v62  ;;  %v996_v2 = vpop.xlane.xlu1 %995 }
 0x5d1   :  { %v1018_v3 = vmul.f32 0.6931472, %v1449_v63  ;;  %1458 = vlog2.f32 %v996_v2  ;;  %v1006_v5 = vpop.xlane.xlu0 %1005 }
 0x5d2   :  { %v1052_v6 = vsub.f32 %v1699_v54, %v1024_v0  ;;  %1460 = vlog2.f32 %v1006_v5 }
 0x5d3   :  { %v1451_v7 = vpop.eup %1450  ;;  %v1049_v8 = vsub.f32 %v1695_v42, %v1018_v3 }
 0x5d4   :  { %v1453_v10 = vpop.eup %1452  ;;  %1068 = vst [vmem:[%s1818_s8 + $0x18] sm:$0xff] %v1052_v6  ;;  %v1020_v40 = vmul.f32 0.6931472, %v1451_v7  ;;  %v1008_v11 = vpop.xlane.xlu1 %1007 }
 0x5d5   :  { %1065 = vst [vmem:[%s1818_s8] sm:$0xff] %v1049_v8  ;;  %v1030_v13 = vmul.f32 0.6931472, %v1453_v10  ;;  %1462 = vlog2.f32 %v1008_v11  ;;  %v1002_v14 = vpop.xlane.xlu0 %1001 }
 0x5d6   :  { %v1050_v54 = vsub.f32 %v1701_v55, %v1020_v40  ;;  %1464 = vlog2.f32 %v1002_v14 }
 0x5d7   :  { %v1455_v15 = vpop.eup %1454  ;;  %v1055_v42 = vsub.f32 %v1705_v59, %v1030_v13 }
 0x5d8   :  { %v1457_v17 = vpop.eup %1456  ;;  %1066 = vst [vmem:[%s1818_s8 + $0x8] sm:$0xff] %v1050_v54  ;;  %v1032_v43 = vmul.f32 0.6931472, %v1455_v15  ;;  %v1004_v45 = vpop.xlane.xlu1 %1003 }
 0x5d9   :  { %1071 = vst [vmem:[%s1818_s8 + $0x30] sm:$0xff] %v1055_v42  ;;  %v1026_v46 = vmul.f32 0.6931472, %v1457_v17  ;;  %1466 = vlog2.f32 %v1004_v45  ;;  %v1010_v47 = vpop.xlane.xlu0 %1009 }
 0x5da   :  { %v1056_v55 = vsub.f32 %v1707_v61, %v1032_v43  ;;  %1468 = vlog2.f32 %v1010_v47 }
 0x5db   :  { %v1459_v48 = vpop.eup %1458  ;;  %v1053_v59 = vsub.f32 %v1711_v1, %v1026_v46 }
 0x5dc   :  { %v1461_v18 = vpop.eup %1460  ;;  %1072 = vst [vmem:[%s1818_s8 + $0x38] sm:$0xff] %v1056_v55  ;;  %v1028_v19 = vmul.f32 0.6931472, %v1459_v48  ;;  %v1012_v20 = vpop.xlane.xlu1 %1011 }
 0x5dd   :  { %1069 = vst [vmem:[%s1818_s8 + $0x20] sm:$0xff] %v1053_v59  ;;  %v1038_v21 = vmul.f32 0.6931472, %v1461_v18  ;;  %1470 = vlog2.f32 %v1012_v20  ;;  %v1014_v23 = vpop.xlane.xlu0 %1013 }
 0x5de   :  { %v1054_v61 = vsub.f32 %v1713_v4, %v1028_v19  ;;  %1472 = vlog2.f32 %v1014_v23 }
 0x5df   :  { %v1463_v24 = vpop.eup %1462  ;;  %v1059_v1 = vsub.f32 %v1717_v9, %v1038_v21 }
 0x5e0   :  { %v1465_v26 = vpop.eup %1464  ;;  %1070 = vst [vmem:[%s1818_s8 + $0x28] sm:$0xff] %v1054_v61  ;;  %v1040_v27 = vmul.f32 0.6931472, %v1463_v24  ;;  %v1016_v28 = vpop.xlane.xlu1 %1015 }
 0x5e1   :  { %1075 = vst [vmem:[%s1818_s8 + $0x50] sm:$0xff] %v1059_v1  ;;  %v1034_v29 = vmul.f32 0.6931472, %v1465_v26  ;;  %1474 = vlog2.f32 %v1016_v28 }
 0x5e2   :  { %v1060_v31 = vsub.f32 %v1719_v12, %v1040_v27 }
 0x5e3   :  { %v1467_v4 = vpop.eup %1466  ;;  %v1057_v32 = vsub.f32 %v1723_v16, %v1034_v29 }
 0x5e4   :  { %v1469_v33 = vpop.eup %1468  ;;  %1076 = vst [vmem:[%s1818_s8 + $0x58] sm:$0xff] %v1060_v31  ;;  %v1036_v9 = vmul.f32 0.6931472, %v1467_v4 }
 0x5e5   :  { %1073 = vst [vmem:[%s1818_s8 + $0x40] sm:$0xff] %v1057_v32  ;;  %v1042_v34 = vmul.f32 0.6931472, %v1469_v33 }
 0x5e6   :  { %v1058_v35 = vsub.f32 %v1726_v44, %v1036_v9 }
 0x5e7   :  { %v1471_v36 = vpop.eup %1470  ;;  %v1061_v37 = vsub.f32 %v1731_v49, %v1042_v34 }
 0x5e8   :  { %v1473_v12 = vpop.eup %1472  ;;  %1074 = vst [vmem:[%s1818_s8 + $0x48] sm:$0xff] %v1058_v35  ;;  %v1044_v16 = vmul.f32 0.6931472, %v1471_v36 }
 0x5e9   :  { %1077 = vst [vmem:[%s1818_s8 + $0x60] sm:$0xff] %v1061_v37  ;;  %v1046_v38 = vmul.f32 0.6931472, %v1473_v12 }
 0x5ea   :  { %v1062_v39 = vsub.f32 %v1735_v22, %v1044_v16 }
 0x5eb   :  { %v1475_v41 = vpop.eup %1474  ;;  %v1063_v50 = vsub.f32 %v1739_v25, %v1046_v38 }
 0x5ec   :  { %1078 = vst [vmem:[%s1818_s8 + $0x68] sm:$0xff] %v1062_v39  ;;  %v1048_v44 = vmul.f32 0.6931472, %v1475_v41 }
 0x5ed   :  { %1079 = vst [vmem:[%s1818_s8 + $0x70] sm:$0xff] %v1063_v50 }
 0x5ee   :  { %v1064_v49 = vsub.f32 %v1743_v30, %v1048_v44 }
 0x5f0   :  { %1080 = vst [vmem:[%s1818_s8 + $0x78] sm:$0xff] %v1064_v49 }

</bundles_post_ra>
